<compile_context>
chip_gen: v6e
topology: v6e:2x2x1
jax: 0.10.0
libtpu: 0.0.40
codegen_flags: <defaults>
</compile_context>

<pallas_src>
import functools

import jax
import jax.numpy as jnp
from jax.experimental import pallas as pl
from jax.experimental.pallas import tpu as pltpu

LANE = 128
SUBLANE = 8


# ---------------------------------------------------------------------------
# Padding / tiling helpers (lane-dense layout)
# ---------------------------------------------------------------------------
def _pad_to(n, m):
    return ((n + m - 1) // m) * m


def _pad2d(x, rows, cols, dtype):
    r, c = x.shape
    out = jnp.zeros((rows, cols), dtype)
    return out.at[:r, :c].set(x.astype(dtype))


def _pick_tile(dim, pref):
    """Largest multiple of LANE <= pref that divides `dim`.

    `dim` must already be a multiple of LANE, so the fallback of LANE always
    divides it -> can never return 0 (fixes the previous ZeroDivisionError
    path).  Padding N up to the tile pref would inflate the O(N^2) adjacency
    traffic, so we accept a smaller divisor tile instead.
    """
    assert dim % LANE == 0
    t = max(min(pref, dim) // LANE * LANE, LANE)
    while dim % t:
        t -= LANE
    return max(t, LANE)


def _tile_prefs():
    """(tm_pref, tk_pref) per TPU generation."""
    kind = jax.devices()[0].device_kind.lower()
    if "v5" in kind:
        # Lowest HBM BW -> big row tiles matter most; keep K moderate.
        return 512, 512
    # v6e / v7x: per-tile VMEM at (512, 1024) is only a few MiB -> go big.
    return 512, 1024


# ---------------------------------------------------------------------------
# Fused GCN layer:  out = relu( A @ (X @ W) + b )
#   grid = (Np/tm "parallel", Np/tk "arbitrary")
#   A streamed as (tm, tk) tiles; X fully VMEM-resident (or (tk,Fin) streamed
#   for very large graphs); W / b resident; f32 accumulator in VMEM.
# ---------------------------------------------------------------------------
def _gcn_layer_kernel(a_ref, x_ref, w_ref, b_ref, o_ref, acc_ref, *,
                      relu, tk, x_resident):
    k = pl.program_id(1)

    @pl.when(k == 0)
    def _init():
        acc_ref[...] = jnp.zeros_like(acc_ref)

    if x_resident:
        start = pl.multiple_of(k * tk, LANE)
        x_blk = x_ref[pl.ds(start, tk), :]
    else:
        x_blk = x_ref[...]

    # Recompute the (tk, Fout) X@W tile here: Fin/tm extra MXU flops, fully
    # hidden under the HBM-bound A stream; avoids an HBM intermediate.
    xw = jnp.dot(x_blk, w_ref[...], preferred_element_type=jnp.float32)
    acc_ref[...] += jnp.dot(a_ref[...], xw.astype(a_ref.dtype),
                            preferred_element_type=jnp.float32)

    @pl.when(k == pl.num_programs(1) - 1)
    def _finalize():
        r = acc_ref[...] + b_ref[...]          # (1, Fout) bcast over sublanes
        if relu:
            r = jnp.maximum(r, 0.0)
        o_ref[...] = r.astype(o_ref.dtype)


def gcn_layer(a, x, w, b, *, out_dtype=jnp.bfloat16):
    Np, Np2 = a.shape
    Nx, Fin = x.shape
    Fin2, Fout = w.shape
    assert Np == Np2 == Nx and Fin == Fin2 and b.shape == (1, Fout)

    tm_pref, tk_pref = _tile_prefs()
    tm = _pick_tile(Np, tm_pref)
    tk = _pick_tile(Np, tk_pref)
    grid = (Np // tm, Np // tk)

    # Keep X fully VMEM-resident unless the graph is huge.
    x_resident = (2 * Np * Fin * 2) <= (16 << 20)
    if x_resident:
        x_spec = pl.BlockSpec((Np, Fin), lambda i, k: (0, 0))
        x_vmem = 2 * Np * Fin * 2
    else:
        x_spec = pl.BlockSpec((tk, Fin), lambda i, k: (k, 0))
        x_vmem = 2 * tk * Fin * 2

    out_b = jnp.dtype(out_dtype).itemsize
    vmem = (2 * tm * tk * 2 + x_vmem + 2 * Fin * Fout * 2 + 2 * Fout * 4
            + 2 * tm * Fout * out_b + tm * Fout * 4)
    vmem = int(min(max(int(vmem * 1.25) + (1 << 20), 4 << 20), 64 << 20))

    cost = pl.CostEstimate(
        flops=2 * Np * Np * Fout + 2 * Np * Fin * Fout * grid[0],
        transcendentals=0,
        bytes_accessed=Np * Np * 2 + Np * Fin * 2 + Fin * Fout * 2
        + Np * Fout * out_b + Fout * 4,
    )

    return pl.pallas_call(
        functools.partial(_gcn_layer_kernel, relu=True, tk=tk,
                          x_resident=x_resident),
        out_shape=jax.ShapeDtypeStruct((Np, Fout), out_dtype),
        grid_spec=pltpu.PrefetchScalarGridSpec(
            num_scalar_prefetch=0,
            grid=grid,
            in_specs=[
                pl.BlockSpec((tm, tk), lambda i, k: (i, k)),     # A tiles
                x_spec,                                          # X
                pl.BlockSpec((Fin, Fout), lambda i, k: (0, 0)),  # W resident
                pl.BlockSpec((1, Fout), lambda i, k: (0, 0)),    # bias
            ],
            out_specs=pl.BlockSpec((tm, Fout), lambda i, k: (i, 0)),
            scratch_shapes=[pltpu.VMEM((tm, Fout), jnp.float32)],
        ),
        compiler_params=pltpu.CompilerParams(
            dimension_semantics=("parallel", "arbitrary"),
            vmem_limit_bytes=vmem,
        ),
        cost_estimate=cost,
    )(a, x, w, b)


# ---------------------------------------------------------------------------
# Fused head:  out = log_softmax( (Pool @ H2) @ Wfc + bfc )
#   grid = (Np/tk "arbitrary"); Pool/H2 streamed over K, Wfc/bfc resident;
#   padded class columns are masked out of the softmax reduce.
# ---------------------------------------------------------------------------
def _head_kernel(pool_ref, h_ref, wfc_ref, bfc_ref, o_ref, acc_ref, *, n_cls):
    k = pl.program_id(0)

    @pl.when(k == 0)
    def _init():
        acc_ref[...] = jnp.zeros_like(acc_ref)

    acc_ref[...] += jnp.dot(pool_ref[...], h_ref[...],
                            preferred_element_type=jnp.float32)

    @pl.when(k == pl.num_programs(0) - 1)
    def _finalize():
        p = acc_ref[...].astype(wfc_ref.dtype)
        logits = jnp.dot(p, wfc_ref[...],
                         preferred_element_type=jnp.float32) + bfc_ref[...]
        col = jax.lax.broadcasted_iota(jnp.int32, logits.shape, 1)
        logits = jnp.where(col < n_cls, logits, -1e30)   # mask padded classes
        m = jnp.max(logits, axis=1, keepdims=True)
        z = logits - m
        lse = jnp.log(jnp.sum(jnp.exp(z), axis=1, keepdims=True))
        o_ref[...] = (z - lse).astype(o_ref.dtype)


def pooled_head(pool, h, wfc, bfc, *, n_cls):
    Gp, Np = pool.shape
    Np2, Fo = h.shape
    Fo2, Cp = wfc.shape
    assert Np == Np2 and Fo == Fo2 and bfc.shape == (1, Cp)

    tk = _pick_tile(Np, _tile_prefs()[1])
    grid = (Np // tk,)

    vmem = (2 * Gp * tk * 2 + 2 * tk * Fo * 2 + 2 * Fo * Cp * 2 + 2 * Cp * 4
            + 2 * Gp * Cp * 4 + Gp * Fo * 4)
    vmem = int(min(max(int(vmem * 1.25) + (1 << 20), 4 << 20), 64 << 20))

    cost = pl.CostEstimate(
        flops=2 * Gp * Np * Fo + 2 * Gp * Fo * Cp,
        transcendentals=Gp * Cp,
        bytes_accessed=Gp * Np * 2 + Np * Fo * 2 + Fo * Cp * 2 + Gp * Cp * 4,
    )

    return pl.pallas_call(
        functools.partial(_head_kernel, n_cls=n_cls),
        out_shape=jax.ShapeDtypeStruct((Gp, Cp), jnp.float32),
        grid_spec=pltpu.PrefetchScalarGridSpec(
            num_scalar_prefetch=0,
            grid=grid,
            in_specs=[
                pl.BlockSpec((Gp, tk), lambda k: (0, k)),    # Pool columns
                pl.BlockSpec((tk, Fo), lambda k: (k, 0)),    # H2 rows
                pl.BlockSpec((Fo, Cp), lambda k: (0, 0)),    # Wfc resident
                pl.BlockSpec((1, Cp), lambda k: (0, 0)),     # bfc resident
            ],
            out_specs=pl.BlockSpec((Gp, Cp), lambda k: (0, 0)),
            scratch_shapes=[pltpu.VMEM((Gp, Fo), jnp.float32)],
        ),
        compiler_params=pltpu.CompilerParams(
            dimension_semantics=("arbitrary",),
            vmem_limit_bytes=vmem,
        ),
        cost_estimate=cost,
    )(pool, h, wfc, bfc)


# ---------------------------------------------------------------------------
# Full forward: pad + cast to bf16, run the 3 fused kernels, slice real block.
# ---------------------------------------------------------------------------
@functools.partial(jax.jit, static_argnames=("n_cls",))
def gcn_forward(x, a_norm, pool, w1, b1, w2, b2, wfc, bfc, *, n_cls):
    num_nodes, in_feats = x.shape
    num_graphs = pool.shape[0]

    Np = _pad_to(num_nodes, LANE)
    Fin = _pad_to(in_feats, LANE)
    Fh = _pad_to(w1.shape[1], LANE)
    Fo = _pad_to(w2.shape[1], LANE)
    Cp = _pad_to(wfc.shape[1], LANE)
    Gp = _pad_to(num_graphs, SUBLANE)

    bf = jnp.bfloat16
    xp = _pad2d(x, Np, Fin, bf)
    ap = _pad2d(a_norm, Np, Np, bf)
    poolp = _pad2d(pool, Gp, Np, bf)
    w1p = _pad2d(w1, Fin, Fh, bf)
    w2p = _pad2d(w2, Fh, Fo, bf)
    wfcp = _pad2d(wfc, Fo, Cp, bf)
    b1p = _pad2d(b1.reshape(1, -1), 1, Fh, jnp.float32)
    b2p = _pad2d(b2.reshape(1, -1), 1, Fo, jnp.float32)
    bfcp = _pad2d(bfc.reshape(1, -1), 1, Cp, jnp.float32)

    # TODO(synk): for large batched-graph inputs, exploit the block-diagonal
    # structure of A / Pool via PrefetchScalarGridSpec (per-graph node
    # offsets) so all-zero off-diagonal A tiles are never DMA'd or multiplied,
    # and quantize A to int8 (v5e/v6e) / fp8 (v7x) with per-row scales to
    # halve the dominant A HBM traffic.

    h1 = gcn_layer(ap, xp, w1p, b1p)       # relu(A @ (X  @ W1) + b1), fused
    h2 = gcn_layer(ap, h1, w2p, b2p)       # relu(A @ (h1 @ W2) + b2), fused
    out = pooled_head(poolp, h2, wfcp, bfcp, n_cls=n_cls)   # pool+fc+logsm
    return out[:num_graphs, :n_cls]


# ---------------------------------------------------------------------------
# Glue: normalized adjacency (A + I, sym-normalized) and mean-pool matrix.
# ---------------------------------------------------------------------------
def build_norm_adj(edge_index, num_nodes):
    src, dst = edge_index[0], edge_index[1]
    a = jnp.zeros((num_nodes, num_nodes), jnp.float32)
    a = a.at[dst, src].add(1.0)                      # duplicates add (PyG-like)
    a = a + jnp.eye(num_nodes, dtype=jnp.float32)    # self loops
    deg = jnp.sum(a, axis=1)
    dinv = jnp.where(deg > 0, 1.0 / jnp.sqrt(deg), 0.0)
    return a * dinv[:, None] * dinv[None, :]


def build_mean_pool(batch, num_graphs, num_nodes):
    onehot = (batch[None, :] == jnp.arange(num_graphs)[:, None]).astype(jnp.float32)
    counts = jnp.maximum(jnp.sum(onehot, axis=1, keepdims=True), 1.0)
    return onehot / counts                           # [num_graphs, num_nodes]


def glorot(key, shape):
    fan_in, fan_out = shape
    lim = jnp.sqrt(6.0 / (fan_in + fan_out))
    return jax.random.uniform(key, shape, jnp.float32, -lim, lim)


# Pure-JAX reference matching the bf16-matmul / f32-accumulate pipeline.
def ref_forward(x, a, pool, w1, b1, w2, b2, wfc, bfc):
    bf = jnp.bfloat16

    def mm(u, v):
        return jnp.dot(u.astype(bf), v.astype(bf),
                       preferred_element_type=jnp.float32)

    xw1 = mm(x, w1).astype(bf)
    h1 = jnp.maximum(mm(a, xw1) + b1[None, :], 0.0).astype(bf)
    hw2 = mm(h1, w2).astype(bf)
    h2 = jnp.maximum(mm(a, hw2) + b2[None, :], 0.0).astype(bf)
    p = mm(pool, h2).astype(bf)
    logits = mm(p, wfc) + bfc[None, :]
    return jax.nn.log_softmax(logits, axis=1)


if __name__ == "__main__":
    key = jax.random.PRNGKey(0)
    k = jax.random.split(key, 8)

    # Small problem: 2 graphs of 8 nodes, in_feats=8, hid_feats=16, out_feats=8
    in_feats, hid_feats, out_feats, n_cls = 8, 16, 8, 4
    num_nodes, num_graphs = 16, 2

    x = jax.random.normal(k[0], (num_nodes, in_feats), jnp.float32)

    # bidirectional ring within each graph (nodes 0-7 and 8-15)
    edges = []
    for g in range(num_graphs):
        base = g * 8
        for i in range(8):
            a_n, b_n = base + i, base + (i + 1) % 8
            edges.append((a_n, b_n))
            edges.append((b_n, a_n))
    edge_index = jnp.array(edges, jnp.int32).T            # [2, E]
    batch = jnp.repeat(jnp.arange(num_graphs, dtype=jnp.int32), 8)

    w1 = glorot(k[1], (in_feats, 2 * hid_feats))
    b1 = jnp.zeros((2 * hid_feats,), jnp.float32)
    w2 = glorot(k[2], (2 * hid_feats, out_feats))
    b2 = jnp.zeros((out_feats,), jnp.float32)
    wfc = glorot(k[3], (out_feats, n_cls))
    bfc = jax.random.uniform(k[4], (n_cls,), jnp.float32, -0.1, 0.1)

    a_norm = build_norm_adj(edge_index, num_nodes)
    pool = build_mean_pool(batch, num_graphs, num_nodes)

    out = gcn_forward(x, a_norm, pool, w1, b1, w2, b2, wfc, bfc, n_cls=n_cls)
    out = jax.block_until_ready(out)

    ref = ref_forward(x, a_norm, pool, w1, b1, w2, b2, wfc, bfc)

    assert out.shape == (num_graphs, n_cls)
    assert bool(jnp.all(jnp.isfinite(out)))
    assert jnp.allclose(out, ref, atol=2e-2, rtol=2e-2)
    print("KERNEL_OK")
</pallas_src>

<mosaic_0001>
module attributes {stable_mosaic.version = 11 : i64} {
  func.func @_gcn_layer_kernel(%arg0: i32, %arg1: i32, %arg2: memref<128x128xbf16, #tpu.memory_space<vmem>>, %arg3: memref<128x128xbf16, #tpu.memory_space<vmem>>, %arg4: memref<128x128xbf16, #tpu.memory_space<vmem>>, %arg5: memref<1x128xf32, #tpu.memory_space<vmem>>, %arg6: memref<128x128xbf16, #tpu.memory_space<vmem>>, %arg7: memref<128x128xf32, #tpu.memory_space<vmem>>) attributes {dimension_semantics = [#tpu.dimension_semantics<parallel>, #tpu.dimension_semantics<arbitrary>], iteration_bounds = array<i64: 1, 1>, scalar_prefetch = 0 : i64, scratch_operands = 1 : i64, tpu.core_type = #tpu.core_type<tc>, window_params = [{transform_indices = @transform_0, window_bounds = array<i64: 128, 128>}, {pipeline_mode = #tpu.pipeline_mode<synchronous>, transform_indices = @transform_1, window_bounds = array<i64: 128, 128>}, {pipeline_mode = #tpu.pipeline_mode<synchronous>, transform_indices = @transform_2, window_bounds = array<i64: 128, 128>}, {pipeline_mode = #tpu.pipeline_mode<synchronous>, transform_indices = @transform_3, window_bounds = array<i64: 1, 128>}, {transform_indices = @transform_4, window_bounds = array<i64: 128, 128>}]} {
    %c0_i32 = arith.constant 0 : i32
    %0 = arith.cmpi eq, %arg1, %c0_i32 : i32
    %1 = arith.extui %0 : i1 to i32
    %c0_i32_0 = arith.constant 0 : i32
    %2 = arith.cmpi ne, %1, %c0_i32_0 : i32
    scf.if %2 {
      %cst_12 = arith.constant 0.000000e+00 : f32
      %18 = vector.broadcast %cst_12 : f32 to vector<128x128xf32>
      %c0_13 = arith.constant 0 : index
      %c0_14 = arith.constant 0 : index
      %19 = vector.load %arg7[%c0_13, %c0_14] : memref<128x128xf32, #tpu.memory_space<vmem>>, vector<128x128xf32>
      tpu.vector_store %arg7[%c0_13, %c0_14], %18 {strides = array<i32>} : memref<128x128xf32, #tpu.memory_space<vmem>>, vector<128x128xf32>,
    } else {
    }
    %c128_i32 = arith.constant 128 : i32
    %3 = arith.muli %arg1, %c128_i32 : i32
    %4 = tpu.assume_multiple %3, 128 : i32
    %5 = arith.index_cast %4 : i32 to index
    %c0 = arith.constant 0 : index
    %6 = vector.load %arg3[%5, %c0] : memref<128x128xbf16, #tpu.memory_space<vmem>>, vector<128x128xbf16>
    %c0_1 = arith.constant 0 : index
    %c0_2 = arith.constant 0 : index
    %7 = vector.load %arg4[%c0_1, %c0_2] : memref<128x128xbf16, #tpu.memory_space<vmem>>, vector<128x128xbf16>
    %cst = arith.constant dense<0.000000e+00> : vector<128x128xf32>
    %8 = tpu.matmul %6, %7, %cst {dimension_numbers = #tpu.dot_dimension_numbers<[1], [0], [0], [1], [0, 0, 1, 1], [], []>} : vector<128x128xbf16>, vector<128x128xbf16>, vector<128x128xf32> -> vector<128x128xf32>
    %c0_3 = arith.constant 0 : index
    %c0_4 = arith.constant 0 : index
    %9 = vector.load %arg7[%c0_3, %c0_4] : memref<128x128xf32, #tpu.memory_space<vmem>>, vector<128x128xf32>
    %c0_5 = arith.constant 0 : index
    %c0_6 = arith.constant 0 : index
    %10 = vector.load %arg2[%c0_5, %c0_6] : memref<128x128xbf16, #tpu.memory_space<vmem>>, vector<128x128xbf16>
    %11 = arith.truncf %8 : vector<128x128xf32> to vector<128x128xbf16>
    %cst_7 = arith.constant dense<0.000000e+00> : vector<128x128xf32>
    %12 = tpu.matmul %10, %11, %cst_7 {dimension_numbers = #tpu.dot_dimension_numbers<[1], [0], [0], [1], [0, 0, 1, 1], [], []>} : vector<128x128xbf16>, vector<128x128xbf16>, vector<128x128xf32> -> vector<128x128xf32>
    %13 = arith.addf %9, %12 : vector<128x128xf32>
    %c0_8 = arith.constant 0 : index
    %c0_9 = arith.constant 0 : index
    %14 = vector.load %arg7[%c0_8, %c0_9] : memref<128x128xf32, #tpu.memory_space<vmem>>, vector<128x128xf32>
    tpu.vector_store %arg7[%c0_8, %c0_9], %13 {strides = array<i32>} : memref<128x128xf32, #tpu.memory_space<vmem>>, vector<128x128xf32>,
    %c0_i32_10 = arith.constant 0 : i32
    %15 = arith.cmpi eq, %arg1, %c0_i32_10 : i32
    %16 = arith.extui %15 : i1 to i32
    %c0_i32_11 = arith.constant 0 : i32
    %17 = arith.cmpi ne, %16, %c0_i32_11 : i32
    scf.if %17 {
      %c0_12 = arith.constant 0 : index
      %c0_13 = arith.constant 0 : index
      %18 = vector.load %arg7[%c0_12, %c0_13] : memref<128x128xf32, #tpu.memory_space<vmem>>, vector<128x128xf32>
      %c0_14 = arith.constant 0 : index
      %c0_15 = arith.constant 0 : index
      %19 = vector.load %arg5[%c0_14, %c0_15] : memref<1x128xf32, #tpu.memory_space<vmem>>, vector<1x128xf32>
      %20 = vector.broadcast %19 : vector<1x128xf32> to vector<128x128xf32>
      %21 = arith.addf %18, %20 : vector<128x128xf32>
      %cst_16 = arith.constant 0.000000e+00 : f32
      %22 = vector.broadcast %cst_16 : f32 to vector<128x128xf32>
      %23 = arith.maximumf %21, %22 : vector<128x128xf32>
      %24 = arith.truncf %23 : vector<128x128xf32> to vector<128x128xbf16>
      %c0_17 = arith.constant 0 : index
      %c0_18 = arith.constant 0 : index
      %25 = vector.load %arg6[%c0_17, %c0_18] : memref<128x128xbf16, #tpu.memory_space<vmem>>, vector<128x128xbf16>
      tpu.vector_store %arg6[%c0_17, %c0_18], %24 {strides = array<i32>} : memref<128x128xbf16, #tpu.memory_space<vmem>>, vector<128x128xbf16>,
    } else {
    }
    return
  }
  func.func @transform_0(%arg0: i32, %arg1: i32) -> (i32, i32) {
    %c0_i32 = arith.constant 0 : i32
    return %arg0, %arg1 : i32, i32
  }
  func.func @transform_1(%arg0: i32, %arg1: i32) -> (i32, i32) {
    %c0_i32 = arith.constant 0 : i32
    %c0_i32_0 = arith.constant 0 : i32
    %c0_i32_1 = arith.constant 0 : i32
    return %c0_i32, %c0_i32_0 : i32, i32
  }
  func.func @transform_2(%arg0: i32, %arg1: i32) -> (i32, i32) {
    %c0_i32 = arith.constant 0 : i32
    %c0_i32_0 = arith.constant 0 : i32
    %c0_i32_1 = arith.constant 0 : i32
    return %c0_i32, %c0_i32_0 : i32, i32
  }
  func.func @transform_3(%arg0: i32, %arg1: i32) -> (i32, i32) {
    %c0_i32 = arith.constant 0 : i32
    %c0_i32_0 = arith.constant 0 : i32
    %c0_i32_1 = arith.constant 0 : i32
    return %c0_i32, %c0_i32_0 : i32, i32
  }
  func.func @transform_4(%arg0: i32, %arg1: i32) -> (i32, i32) {
    %c0_i32 = arith.constant 0 : i32
    %c0_i32_0 = arith.constant 0 : i32
    return %arg0, %c0_i32 : i32, i32
  }
}

module attributes {stable_mosaic.version = 11 : i64} {
  func.func @_head_kernel(%arg0: i32, %arg1: memref<8x128xbf16, #tpu.memory_space<vmem>>, %arg2: memref<128x128xbf16, #tpu.memory_space<vmem>>, %arg3: memref<128x128xbf16, #tpu.memory_space<vmem>>, %arg4: memref<1x128xf32, #tpu.memory_space<vmem>>, %arg5: memref<8x128xf32, #tpu.memory_space<vmem>>, %arg6: memref<8x128xf32, #tpu.memory_space<vmem>>) attributes {dimension_semantics = [#tpu.dimension_semantics<arbitrary>], iteration_bounds = array<i64: 1>, scalar_prefetch = 0 : i64, scratch_operands = 1 : i64, tpu.core_type = #tpu.core_type<tc>, window_params = [{transform_indices = @transform_0, window_bounds = array<i64: 8, 128>}, {transform_indices = @transform_1, window_bounds = array<i64: 128, 128>}, {pipeline_mode = #tpu.pipeline_mode<synchronous>, transform_indices = @transform_2, window_bounds = array<i64: 128, 128>}, {pipeline_mode = #tpu.pipeline_mode<synchronous>, transform_indices = @transform_3, window_bounds = array<i64: 1, 128>}, {pipeline_mode = #tpu.pipeline_mode<synchronous>, transform_indices = @transform_4, window_bounds = array<i64: 8, 128>}]} {
    %c0_i32 = arith.constant 0 : i32
    %0 = arith.cmpi eq, %arg0, %c0_i32 : i32
    %1 = arith.extui %0 : i1 to i32
    %c0_i32_0 = arith.constant 0 : i32
    %2 = arith.cmpi ne, %1, %c0_i32_0 : i32
    scf.if %2 {
      %cst_10 = arith.constant 0.000000e+00 : f32
      %12 = vector.broadcast %cst_10 : f32 to vector<8x128xf32>
      %c0_11 = arith.constant 0 : index
      %c0_12 = arith.constant 0 : index
      %13 = vector.load %arg6[%c0_11, %c0_12] : memref<8x128xf32, #tpu.memory_space<vmem>>, vector<8x128xf32>
      tpu.vector_store %arg6[%c0_11, %c0_12], %12 {strides = array<i32>} : memref<8x128xf32, #tpu.memory_space<vmem>>, vector<8x128xf32>,
    } else {
    }
    %c0 = arith.constant 0 : index
    %c0_1 = arith.constant 0 : index
    %3 = vector.load %arg6[%c0, %c0_1] : memref<8x128xf32, #tpu.memory_space<vmem>>, vector<8x128xf32>
    %c0_2 = arith.constant 0 : index
    %c0_3 = arith.constant 0 : index
    %4 = vector.load %arg1[%c0_2, %c0_3] : memref<8x128xbf16, #tpu.memory_space<vmem>>, vector<8x128xbf16>
    %c0_4 = arith.constant 0 : index
    %c0_5 = arith.constant 0 : index
    %5 = vector.load %arg2[%c0_4, %c0_5] : memref<128x128xbf16, #tpu.memory_space<vmem>>, vector<128x128xbf16>
    %cst = arith.constant dense<0.000000e+00> : vector<8x128xf32>
    %6 = tpu.matmul %4, %5, %cst {dimension_numbers = #tpu.dot_dimension_numbers<[1], [0], [0], [1], [0, 0, 1, 1], [], []>} : vector<8x128xbf16>, vector<128x128xbf16>, vector<8x128xf32> -> vector<8x128xf32>
    %7 = arith.addf %3, %6 : vector<8x128xf32>
    %c0_6 = arith.constant 0 : index
    %c0_7 = arith.constant 0 : index
    %8 = vector.load %arg6[%c0_6, %c0_7] : memref<8x128xf32, #tpu.memory_space<vmem>>, vector<8x128xf32>
    tpu.vector_store %arg6[%c0_6, %c0_7], %7 {strides = array<i32>} : memref<8x128xf32, #tpu.memory_space<vmem>>, vector<8x128xf32>,
    %c0_i32_8 = arith.constant 0 : i32
    %9 = arith.cmpi eq, %arg0, %c0_i32_8 : i32
    %10 = arith.extui %9 : i1 to i32
    %c0_i32_9 = arith.constant 0 : i32
    %11 = arith.cmpi ne, %10, %c0_i32_9 : i32
    scf.if %11 {
      %c0_10 = arith.constant 0 : index
      %c0_11 = arith.constant 0 : index
      %12 = vector.load %arg6[%c0_10, %c0_11] : memref<8x128xf32, #tpu.memory_space<vmem>>, vector<8x128xf32>
      %13 = arith.truncf %12 : vector<8x128xf32> to vector<8x128xbf16>
      %c0_12 = arith.constant 0 : index
      %c0_13 = arith.constant 0 : index
      %14 = vector.load %arg3[%c0_12, %c0_13] : memref<128x128xbf16, #tpu.memory_space<vmem>>, vector<128x128xbf16>
      %cst_14 = arith.constant dense<0.000000e+00> : vector<8x128xf32>
      %15 = tpu.matmul %13, %14, %cst_14 {dimension_numbers = #tpu.dot_dimension_numbers<[1], [0], [0], [1], [0, 0, 1, 1], [], []>} : vector<8x128xbf16>, vector<128x128xbf16>, vector<8x128xf32> -> vector<8x128xf32>
      %c0_15 = arith.constant 0 : index
      %c0_16 = arith.constant 0 : index
      %16 = vector.load %arg4[%c0_15, %c0_16] : memref<1x128xf32, #tpu.memory_space<vmem>>, vector<1x128xf32>
      %17 = vector.broadcast %16 : vector<1x128xf32> to vector<8x128xf32>
      %18 = arith.addf %15, %17 : vector<8x128xf32>
      %19 = tpu.iota {dimensions = array<i32: 1>} : vector<8x128xi32>
      %c4_i32 = arith.constant 4 : i32
      %20 = vector.broadcast %c4_i32 : i32 to vector<8x128xi32>
      %21 = arith.cmpi slt, %19, %20 : vector<8x128xi32>
      %cst_17 = arith.constant -1.000000e+30 : f32
      %22 = vector.broadcast %cst_17 : f32 to vector<8x128xf32>
      %23 = arith.select %21, %18, %22 : vector<8x128xi1>, vector<8x128xf32>
      %cst_18 = arith.constant dense<0xFF800000> : vector<8xf32>
      %24 = vector.multi_reduction <maximumf>, %23, %cst_18 [1] : vector<8x128xf32> to vector<8xf32>
      %25 = vector.shape_cast %24 : vector<8xf32> to vector<8x1xf32>
      %26 = vector.broadcast %25 : vector<8x1xf32> to vector<8x128xf32>
      %27 = arith.subf %23, %26 : vector<8x128xf32>
      %28 = math.exp %27 : vector<8x128xf32>
      %cst_19 = arith.constant dense<0.000000e+00> : vector<8xf32>
      %29 = vector.multi_reduction <add>, %28, %cst_19 [1] : vector<8x128xf32> to vector<8xf32>
      %30 = vector.shape_cast %29 : vector<8xf32> to vector<8x1xf32>
      %31 = math.log %30 : vector<8x1xf32>
      %32 = vector.broadcast %31 : vector<8x1xf32> to vector<8x128xf32>
      %33 = arith.subf %27, %32 : vector<8x128xf32>
      %c0_20 = arith.constant 0 : index
      %c0_21 = arith.constant 0 : index
      %34 = vector.load %arg5[%c0_20, %c0_21] : memref<8x128xf32, #tpu.memory_space<vmem>>, vector<8x128xf32>
      tpu.vector_store %arg5[%c0_20, %c0_21], %33 {strides = array<i32>} : memref<8x128xf32, #tpu.memory_space<vmem>>, vector<8x128xf32>,
    } else {
    }
    return
  }
  func.func @transform_0(%arg0: i32) -> (i32, i32) {
    %c0_i32 = arith.constant 0 : i32
    %c0_i32_0 = arith.constant 0 : i32
    return %c0_i32, %arg0 : i32, i32
  }
  func.func @transform_1(%arg0: i32) -> (i32, i32) {
    %c0_i32 = arith.constant 0 : i32
    %c0_i32_0 = arith.constant 0 : i32
    return %arg0, %c0_i32 : i32, i32
  }
  func.func @transform_2(%arg0: i32) -> (i32, i32) {
    %c0_i32 = arith.constant 0 : i32
    %c0_i32_0 = arith.constant 0 : i32
    %c0_i32_1 = arith.constant 0 : i32
    return %c0_i32, %c0_i32_0 : i32, i32
  }
  func.func @transform_3(%arg0: i32) -> (i32, i32) {
    %c0_i32 = arith.constant 0 : i32
    %c0_i32_0 = arith.constant 0 : i32
    %c0_i32_1 = arith.constant 0 : i32
    return %c0_i32, %c0_i32_0 : i32, i32
  }
  func.func @transform_4(%arg0: i32) -> (i32, i32) {
    %c0_i32 = arith.constant 0 : i32
    %c0_i32_0 = arith.constant 0 : i32
    %c0_i32_1 = arith.constant 0 : i32
    return %c0_i32, %c0_i32_0 : i32, i32
  }
}

</mosaic_0001>

<bundles_post_ra>
// kernel: gcn_forward.5
= control target key start
LH: loop header
LB: loop body
LE: loop exit
PB: predicated region body
PF: predicated region fallthrough
CT: control target
= control target key end

     0   :  { %v363_v0 = vmov 0.0   ;;  %vm364_vm0 = vmmov 0   ;;  %v247_v23 = vlaneseq  ;;  %s447_s1 = inlined_call_operand.vmem [shape: bf16[128,128], index: 1, kind: input, shape index: {}]   ;;  %s448_s2 = inlined_call_operand.vmem [shape: bf16[128,128], index: 2, kind: input, shape index: {}]   ;;  %s449_s0 = inlined_call_operand.vmem [shape: bf16[8,128], index: 0, kind: input, shape index: {}]   ;;  %s450_s3 = inlined_call_operand.vmem [shape: f32[1,128], index: 3, kind: input, shape index: {}]   ;;  %s451_s4 = inlined_call_operand.vmem [shape: f32[8,128], index: 4, kind: output, shape index: {}]  }
   0x1   :  { %301 = vmatprep.subr.bf16.mxu0 %v363_v0  ;;  %v343_v1 = vld [vmem:[%s447_s1 + $0x38] sm:$0xff]   ;;  %317 = vmatprep.mubr.msk.bf16.mxu0 %vm364_vm0, %v363_v0  ;;  %v344_v2 = vld [vmem:[%s447_s1 + $0x30] sm:$0xff]   ;;  %v345_v3 = vld [vmem:[%s447_s1 + $0x28] sm:$0xff]  }
   0x2   :  { %321 = vmatprep.subr.bf16.mxu1 %v363_v0  ;;  %337 = vmatprep.mubr.msk.bf16.mxu1 %vm364_vm0, %v363_v0  ;;  %v351_v4 = vld [vmem:[%s448_s2 + $0x38] sm:$0xff]   ;;  %v346_v5 = vld [vmem:[%s447_s1 + $0x20] sm:$0xff]   ;;  %v352_v6 = vld [vmem:[%s448_s2 + $0x30] sm:$0xff]   ;;  %v248_v24 = vand.u32 127, %v247_v23 }
   0x3   :  { %302 = vmatpush3.bf16.msra.mxu0 %v343_v1  ;;  %322 = vmatpush3.bf16.msra.mxu1 %v351_v4  ;;  %v347_v7 = vld [vmem:[%s447_s1 + $0x18] sm:$0xff]   ;;  %v353_v8 = vld [vmem:[%s448_s2 + $0x28] sm:$0xff]   ;;  %v348_v9 = vld [vmem:[%s447_s1 + $0x10] sm:$0xff]  }
   0x4   :  { %303 = vmatprep.subr.bf16.mxu0 %v363_v0  ;;  %323 = vmatprep.subr.bf16.mxu1 %v363_v0  ;;  %v354_v10 = vld [vmem:[%s448_s2 + $0x20] sm:$0xff]   ;;  %v349_v11 = vld [vmem:[%s447_s1 + $0x8] sm:$0xff]   ;;  %v355_v12 = vld [vmem:[%s448_s2 + $0x18] sm:$0xff]   ;;  %vm249_vm1 = vcmp.lt.s32.totalorder %v248_v24, 4 }
   0x5   :  { %v350_v13 = vld [vmem:[%s447_s1] sm:$0xff]   ;;  %v356_v14 = vld [vmem:[%s448_s2 + $0x10] sm:$0xff]   ;;  %v357_v16 = vld [vmem:[%s448_s2 + $0x8] sm:$0xff]  }
   0x6   :  { %v24_v15 = vld [vmem:[%s449_s0] sm:$0xf] }
   0x7   :  { %304 = vmatpush3.bf16.msra.mxu0 %v344_v2  ;;  %324 = vmatpush3.bf16.msra.mxu1 %v352_v6  ;;  %v358_v17 = vld [vmem:[%s448_s2] sm:$0xff]  }
   0x8   :  { %305 = vmatprep.subr.bf16.mxu0 %v363_v0  ;;  %325 = vmatprep.subr.bf16.mxu1 %v363_v0  ;;  %v274_v25 = vld [vmem:[%s450_s3] ss:$0 sm:$0xff] }
   0xb   :  { %306 = vmatpush3.bf16.msra.mxu0 %v345_v3  ;;  %326 = vmatpush3.bf16.msra.mxu1 %v353_v8 }
   0xc   :  { %307 = vmatprep.subr.bf16.mxu0 %v363_v0  ;;  %327 = vmatprep.subr.bf16.mxu1 %v363_v0 }
   0xf   :  { %308 = vmatpush3.bf16.msra.mxu0 %v346_v5  ;;  %328 = vmatpush3.bf16.msra.mxu1 %v354_v10 }
  0x10   :  { %309 = vmatprep.subr.bf16.mxu0 %v363_v0  ;;  %329 = vmatprep.subr.bf16.mxu1 %v363_v0 }
  0x13   :  { %310 = vmatpush3.bf16.msra.mxu0 %v347_v7  ;;  %330 = vmatpush3.bf16.msra.mxu1 %v355_v12 }
  0x14   :  { %311 = vmatprep.subr.bf16.mxu0 %v363_v0  ;;  %331 = vmatprep.subr.bf16.mxu1 %v363_v0 }
  0x17   :  { %312 = vmatpush3.bf16.msra.mxu0 %v348_v9  ;;  %332 = vmatpush3.bf16.msra.mxu1 %v356_v14 }
  0x18   :  { %313 = vmatprep.subr.bf16.mxu0 %v363_v0  ;;  %333 = vmatprep.subr.bf16.mxu1 %v363_v0 }
  0x1b   :  { %314 = vmatpush3.bf16.msra.mxu0 %v349_v11  ;;  %334 = vmatpush3.bf16.msra.mxu1 %v357_v16 }
  0x1c   :  { %315 = vmatprep.subr.bf16.mxu0 %v363_v0  ;;  %335 = vmatprep.subr.bf16.mxu1 %v363_v0 }
  0x1f   :  { %316 = vmatpush3.bf16.msra.mxu0 %v350_v13  ;;  %336 = vmatpush3.bf16.msra.mxu1 %v358_v17 }
  0x22   :  { %318 = vmatmul.mubr.bf16.vlgmr.msra.gmra.mxu0 %v24_v15 }
  0xe2   :  { %v123_v18 = vpop.f32.mrf.mxu0 }
  0xe3   :  { %v135_v19 = vpack.c.bf16 %v123_v18, %v123_v18 }
  0xe4   :  { %v319_v20 = vpop.f32.mrf.mxu0 }
  0xe5   :  { %338 = vmatmul.mubr.bf16.vlgmr.msra.gmra.mxu1 %v135_v19 }
  0xe6   :  { %v126_v21 = vpop.f32.mrf.mxu0 }
  0xe8   :  { %v320_v22 = vpop.f32.mrf.mxu0 }
 0x1a5   :  { %v241_v26 = vpop.f32.mrf.mxu1 }
 0x1a6   :  { %v242_v27 = vadd.f32 %v274_v25, %v241_v26 }
 0x1a7   :  { %v339_v28 = vpop.f32.mrf.mxu1 }
 0x1a8   :  { %v250_v29 = vsel %vm249_vm1, %v242_v27, -1e+30 }
 0x1a9   :  { %251 = vmax.xlane.f32.xlu0 %v250_v29  ;;  %v244_v30 = vpop.f32.mrf.mxu1 }
 0x1ab   :  { %v340_v31 = vpop.f32.mrf.mxu1 }
 0x232   :  { %v252_v32 = vpop.xlane.xlu0 %251 }
 0x233   :  { %v253_v33 = vsub.f32 %v250_v29, %v252_v32 }
 0x235   :  { %v254_v34 = vmul.f32 1.442695, %v253_v33 }
 0x237   :  { %359 = vpow2.f32 %v254_v34 }
 0x244   :  { %v360_v35 = vpop.eup %359 }
 0x245   :  { %256 = vadd.xlane.f32.xlu0 %v360_v35 }
 0x2ce   :  { %v257_v36 = vpop.xlane.xlu0 %256 }
 0x2cf   :  { %361 = vlog2.f32 %v257_v36 }
 0x2dc   :  { %v362_v37 = vpop.eup %361 }
 0x2dd   :  { %v259_v38 = vmul.f32 0.6931472, %v362_v37 }
 0x2df   :  { %v260_v39 = vsub.f32 %v253_v33, %v259_v38 }
 0x2e1   :  { %261 = vst [vmem:[%s451_s4] sm:$0xff] %v260_v39 }

// kernel: gcn_forward.3
= control target key start
LH: loop header
LB: loop body
LE: loop exit
PB: predicated region body
PF: predicated region fallthrough
CT: control target
= control target key end

     0   :  { %s977_s2 = inlined_call_operand.vmem [shape: bf16[128,128], index: 2, kind: input, shape index: {}]   ;;  %s978_s1 = inlined_call_operand.vmem [shape: bf16[128,128], index: 1, kind: input, shape index: {}]   ;;  %s979_s0 = inlined_call_operand.vmem [shape: bf16[128,128], index: 0, kind: input, shape index: {}]   ;;  %s980_s3 = inlined_call_operand.vmem [shape: f32[1,128], index: 3, kind: input, shape index: {}]   ;;  %s981_s4 = inlined_call_operand.vmem [shape: bf16[128,128], index: 4, kind: output, shape index: {}]  }
   0x1   :  { %v829_v0 = vld [vmem:[%s977_s2 + $0x38] sm:$0xff]   ;;  %v830_v1 = vld [vmem:[%s977_s2 + $0x30] sm:$0xff]   ;;  %v831_v2 = vld [vmem:[%s977_s2 + $0x28] sm:$0xff]  }
   0x2   :  { %765 = vmatprep.subr.bf16.mxu0 %v829_v0  ;;  %v832_v3 = vld [vmem:[%s977_s2 + $0x20] sm:$0xff]   ;;  %v833_v5 = vld [vmem:[%s977_s2 + $0x18] sm:$0xff]   ;;  %v834_v6 = vld [vmem:[%s977_s2 + $0x10] sm:$0xff]  }
   0x3   :  { %766 = vmatpush3.bf16.msra.mxu0 %v829_v0  ;;  %v837_v4 = vld [vmem:[%s978_s1] sm:$0xff]   ;;  %v835_v7 = vld [vmem:[%s977_s2 + $0x8] sm:$0xff]   ;;  %v839_v10 = vld [vmem:[%s978_s1 + $0x10] sm:$0xff]  }
   0x4   :  { %767 = vmatprep.subr.bf16.mxu0 %v830_v1  ;;  %781 = vmatprep.mubr.bf16.mxu0 %v837_v4  ;;  %v836_v8 = vld [vmem:[%s977_s2] sm:$0xff]   ;;  %v838_v9 = vld [vmem:[%s978_s1 + $0x8] sm:$0xff]   ;;  %v840_v11 = vld [vmem:[%s978_s1 + $0x18] sm:$0xff]  }
   0x5   :  { %v841_v12 = vld [vmem:[%s978_s1 + $0x20] sm:$0xff]   ;;  %v842_v13 = vld [vmem:[%s978_s1 + $0x28] sm:$0xff]   ;;  %v843_v14 = vld [vmem:[%s978_s1 + $0x30] sm:$0xff]  }
   0x6   :  { %v844_v15 = vld [vmem:[%s978_s1 + $0x38] sm:$0xff]   ;;  %v845_v16 = vld [vmem:[%s979_s0] sm:$0xff]   ;;  %v846_v41 = vld [vmem:[%s979_s0 + $0x8] sm:$0xff]  }
   0x7   :  { %768 = vmatpush3.bf16.msra.mxu0 %v830_v1  ;;  %813 = vmatprep.mubr.bf16.mxu1 %v845_v16  ;;  %v847_v42 = vld [vmem:[%s979_s0 + $0x10] sm:$0xff]   ;;  %v848_v43 = vld [vmem:[%s979_s0 + $0x18] sm:$0xff]   ;;  %v849_v44 = vld [vmem:[%s979_s0 + $0x20] sm:$0xff]  }
   0x8   :  { %769 = vmatprep.subr.bf16.mxu0 %v831_v2  ;;  %v850_v45 = vld [vmem:[%s979_s0 + $0x28] sm:$0xff]   ;;  %v851_v46 = vld [vmem:[%s979_s0 + $0x30] sm:$0xff]   ;;  %v852_v47 = vld [vmem:[%s979_s0 + $0x38] sm:$0xff]  }
   0x9   :  { %v653_v49 = vld [vmem:[%s980_s3] ss:$0 sm:$0xff] }
   0xb   :  { %770 = vmatpush3.bf16.msra.mxu0 %v831_v2 }
   0xc   :  { %771 = vmatprep.subr.bf16.mxu0 %v832_v3 }
   0xf   :  { %772 = vmatpush3.bf16.msra.mxu0 %v832_v3 }
  0x10   :  { %773 = vmatprep.subr.bf16.mxu0 %v833_v5 }
  0x13   :  { %774 = vmatpush3.bf16.msra.mxu0 %v833_v5 }
  0x14   :  { %775 = vmatprep.subr.bf16.mxu0 %v834_v6 }
  0x17   :  { %776 = vmatpush3.bf16.msra.mxu0 %v834_v6 }
  0x18   :  { %777 = vmatprep.subr.bf16.mxu0 %v835_v7 }
  0x1b   :  { %778 = vmatpush3.bf16.msra.mxu0 %v835_v7 }
  0x1c   :  { %779 = vmatprep.subr.bf16.mxu0 %v836_v8 }
  0x1f   :  { %780 = vmatpush3.bf16.msra.mxu0 %v836_v8 }
  0x22   :  { %782 = vmatmul.mubr.bf16.vlgmr.msra.gmra.mxu0 %v838_v9 }
  0x23   :  { %785 = vmatprep.mubr.bf16.mxu0 %v839_v10 }
  0x2a   :  { %786 = vmatmul.mubr.bf16.gmra.mxu0 %v840_v11 }
  0x2b   :  { %789 = vmatprep.mubr.bf16.mxu0 %v841_v12 }
  0x32   :  { %790 = vmatmul.mubr.bf16.gmra.mxu0 %v842_v13 }
  0x33   :  { %793 = vmatprep.mubr.bf16.mxu0 %v843_v14 }
  0x3a   :  { %794 = vmatmul.mubr.bf16.gmra.mxu0 %v844_v15 }
  0xe2   :  { %v783_v17 = vpop.f32.mrf.mxu0 }
  0xe4   :  { %v205_v18 = vpop.f32.mrf.mxu0 }
  0xe6   :  { %v784_v19 = vpop.f32.mrf.mxu0 }
  0xe7   :  { %v301_v39 = vpack.c.bf16 %v784_v19, %v783_v17 }
  0xe8   :  { %v208_v20 = vpop.f32.mrf.mxu0 }
  0xe9   :  { %v300_v40 = vpack.c.bf16 %v208_v20, %v205_v18 }
  0xea   :  { %v787_v21 = vpop.f32.mrf.mxu0 }
  0xec   :  { %v221_v22 = vpop.f32.mrf.mxu0 }
  0xee   :  { %v788_v23 = vpop.f32.mrf.mxu0 }
  0xef   :  { %v303_v37 = vpack.c.bf16 %v788_v23, %v787_v21 }
  0xf0   :  { %v224_v24 = vpop.f32.mrf.mxu0 }
  0xf1   :  { %v302_v38 = vpack.c.bf16 %v224_v24, %v221_v22 }
  0xf2   :  { %v791_v25 = vpop.f32.mrf.mxu0 }
  0xf4   :  { %v237_v26 = vpop.f32.mrf.mxu0 }
  0xf6   :  { %v792_v27 = vpop.f32.mrf.mxu0 }
  0xf7   :  { %v305_v35 = vpack.c.bf16 %v792_v27, %v791_v25 }
  0xf8   :  { %v240_v28 = vpop.f32.mrf.mxu0 }
  0xf9   :  { %v304_v36 = vpack.c.bf16 %v240_v28, %v237_v26 }
  0xfa   :  { %v795_v29 = vpop.f32.mrf.mxu0 }
  0xfc   :  { %v253_v30 = vpop.f32.mrf.mxu0 }
  0xfe   :  { %v796_v31 = vpop.f32.mrf.mxu0 }
  0xff   :  { %v307_v32 = vpack.c.bf16 %v796_v31, %v795_v29 }
 0x100   :  { %v256_v33 = vpop.f32.mrf.mxu0 }
 0x101   :  { %v306_v34 = vpack.c.bf16 %v256_v33, %v253_v30  ;;  %797 = vmatprep.subr.bf16.mxu1 %v307_v32 }
 0x102   :  { %798 = vmatpush3.bf16.msra.mxu1 %v307_v32 }
 0x103   :  { %799 = vmatprep.subr.bf16.mxu1 %v306_v34 }
 0x106   :  { %800 = vmatpush3.bf16.msra.mxu1 %v306_v34 }
 0x107   :  { %801 = vmatprep.subr.bf16.mxu1 %v305_v35 }
 0x10a   :  { %802 = vmatpush3.bf16.msra.mxu1 %v305_v35 }
 0x10b   :  { %803 = vmatprep.subr.bf16.mxu1 %v304_v36 }
 0x10e   :  { %804 = vmatpush3.bf16.msra.mxu1 %v304_v36 }
 0x10f   :  { %805 = vmatprep.subr.bf16.mxu1 %v303_v37 }
 0x112   :  { %806 = vmatpush3.bf16.msra.mxu1 %v303_v37 }
 0x113   :  { %807 = vmatprep.subr.bf16.mxu1 %v302_v38 }
 0x116   :  { %808 = vmatpush3.bf16.msra.mxu1 %v302_v38 }
 0x117   :  { %809 = vmatprep.subr.bf16.mxu1 %v301_v39 }
 0x11a   :  { %810 = vmatpush3.bf16.msra.mxu1 %v301_v39 }
 0x11b   :  { %811 = vmatprep.subr.bf16.mxu1 %v300_v40 }
 0x11e   :  { %812 = vmatpush3.bf16.msra.mxu1 %v300_v40 }
 0x121   :  { %814 = vmatmul.mubr.bf16.vlgmr.msra.gmra.mxu1 %v846_v41 }
 0x122   :  { %817 = vmatprep.mubr.bf16.mxu1 %v847_v42 }
 0x129   :  { %818 = vmatmul.mubr.bf16.gmra.mxu1 %v848_v43 }
 0x12a   :  { %821 = vmatprep.mubr.bf16.mxu1 %v849_v44 }
 0x131   :  { %822 = vmatmul.mubr.bf16.gmra.mxu1 %v850_v45 }
 0x132   :  { %825 = vmatprep.mubr.bf16.mxu1 %v851_v46 }
 0x139   :  { %826 = vmatmul.mubr.bf16.gmra.mxu1 %v852_v47 }
 0x1e1   :  { %v815_v48 = vpop.f32.mrf.mxu1 }
 0x1e2   :  { %v513_v51 = vadd.f32 %v815_v48, %v653_v49 }
 0x1e3   :  { %v390_v50 = vpop.f32.mrf.mxu1 }
 0x1e4   :  { %v511_v53 = vadd.f32 %v653_v49, %v390_v50  ;;  %v529_v56 = vmax.f32 %v513_v51, 0.0 }
 0x1e5   :  { %v816_v52 = vpop.f32.mrf.mxu1 }
 0x1e6   :  { %v514_v54 = vadd.f32 %v816_v52, %v653_v49  ;;  %v527_v60 = vmax.f32 %v511_v53, 0.0 }
 0x1e7   :  { %v393_v55 = vpop.f32.mrf.mxu1 }
 0x1e8   :  { %v530_v57 = vmax.f32 %v514_v54, 0.0  ;;  %v512_v58 = vadd.f32 %v653_v49, %v393_v55 }
 0x1e9   :  { %v819_v59 = vpop.f32.mrf.mxu1 }
 0x1ea   :  { %v694_v61 = vpack.c.bf16 %v530_v57, %v529_v56  ;;  %v528_v62 = vmax.f32 %v512_v58, 0.0  ;;  %v517_v1 = vadd.f32 %v819_v59, %v653_v49 }
 0x1eb   :  { %v406_v63 = vpop.f32.mrf.mxu1 }
 0x1ec   :  { %726 = vst [vmem:[%s981_s4 + $0x8] sm:$0xff] %v694_v61   ;;  %v689_v0 = vpack.c.bf16 %v528_v62, %v527_v60  ;;  %v515_v3 = vadd.f32 %v653_v49, %v406_v63  ;;  %v533_v6 = vmax.f32 %v517_v1, 0.0 }
 0x1ed   :  { %v820_v2 = vpop.f32.mrf.mxu1 }
 0x1ee   :  { %690 = vst [vmem:[%s981_s4] sm:$0xff] %v689_v0   ;;  %v518_v4 = vadd.f32 %v820_v2, %v653_v49  ;;  %v531_v10 = vmax.f32 %v515_v3, 0.0 }
 0x1ef   :  { %v409_v5 = vpop.f32.mrf.mxu1 }
 0x1f0   :  { %v534_v7 = vmax.f32 %v518_v4, 0.0  ;;  %v516_v8 = vadd.f32 %v653_v49, %v409_v5 }
 0x1f1   :  { %v823_v9 = vpop.f32.mrf.mxu1 }
 0x1f2   :  { %v704_v11 = vpack.c.bf16 %v534_v7, %v533_v6  ;;  %v532_v12 = vmax.f32 %v516_v8, 0.0  ;;  %v521_v15 = vadd.f32 %v823_v9, %v653_v49 }
 0x1f3   :  { %v422_v13 = vpop.f32.mrf.mxu1 }
 0x1f4   :  { %728 = vst [vmem:[%s981_s4 + $0x18] sm:$0xff] %v704_v11   ;;  %v699_v14 = vpack.c.bf16 %v532_v12, %v531_v10  ;;  %v519_v17 = vadd.f32 %v653_v49, %v422_v13  ;;  %v537_v20 = vmax.f32 %v521_v15, 0.0 }
 0x1f5   :  { %v824_v16 = vpop.f32.mrf.mxu1 }
 0x1f6   :  { %727 = vst [vmem:[%s981_s4 + $0x10] sm:$0xff] %v699_v14   ;;  %v522_v18 = vadd.f32 %v824_v16, %v653_v49  ;;  %v535_v24 = vmax.f32 %v519_v17, 0.0 }
 0x1f7   :  { %v425_v19 = vpop.f32.mrf.mxu1 }
 0x1f8   :  { %v538_v21 = vmax.f32 %v522_v18, 0.0  ;;  %v520_v22 = vadd.f32 %v653_v49, %v425_v19 }
 0x1f9   :  { %v827_v23 = vpop.f32.mrf.mxu1 }
 0x1fa   :  { %v714_v25 = vpack.c.bf16 %v538_v21, %v537_v20  ;;  %v536_v26 = vmax.f32 %v520_v22, 0.0  ;;  %v525_v29 = vadd.f32 %v827_v23, %v653_v49 }
 0x1fb   :  { %v438_v27 = vpop.f32.mrf.mxu1 }
 0x1fc   :  { %730 = vst [vmem:[%s981_s4 + $0x28] sm:$0xff] %v714_v25   ;;  %v709_v28 = vpack.c.bf16 %v536_v26, %v535_v24  ;;  %v523_v31 = vadd.f32 %v653_v49, %v438_v27  ;;  %v541_v34 = vmax.f32 %v525_v29, 0.0 }
 0x1fd   :  { %v828_v30 = vpop.f32.mrf.mxu1 }
 0x1fe   :  { %729 = vst [vmem:[%s981_s4 + $0x20] sm:$0xff] %v709_v28   ;;  %v526_v32 = vadd.f32 %v828_v30, %v653_v49  ;;  %v539_v37 = vmax.f32 %v523_v31, 0.0 }
 0x1ff   :  { %v441_v33 = vpop.f32.mrf.mxu1 }
 0x200   :  { %v542_v35 = vmax.f32 %v526_v32, 0.0  ;;  %v524_v36 = vadd.f32 %v653_v49, %v441_v33 }
 0x202   :  { %v724_v38 = vpack.c.bf16 %v542_v35, %v541_v34  ;;  %v540_v39 = vmax.f32 %v524_v36, 0.0 }
 0x204   :  { %732 = vst [vmem:[%s981_s4 + $0x38] sm:$0xff] %v724_v38   ;;  %v719_v40 = vpack.c.bf16 %v540_v39, %v539_v37 }
 0x206   :  { %731 = vst [vmem:[%s981_s4 + $0x30] sm:$0xff] %v719_v40  }

</bundles_post_ra>
